<compile_context>
chip_gen: v5e
topology: v5e:2x2
jax: 0.10.0
libtpu: 0.0.40
codegen_flags: <defaults>
</compile_context>

<pallas_src>
import functools

import jax
import jax.numpy as jnp
from jax import lax
from jax.experimental import pallas as pl
from jax.experimental.pallas import tpu as pltpu

BN_EPS = 1e-5


def _round_up(x: int, m: int) -> int:
    return (x + m - 1) // m * m


# ---------------------------------------------------------------------------
# Pass 1: conv tile (transposed matmul, lane-dense) + partial BN statistics
# ---------------------------------------------------------------------------
def _conv_stats_kernel(p_ref, w_ref, conv_ref, stats_ref):
    # p_ref:     [1, K, TM]     bf16 im2col patches, TM on the lane axis
    # w_ref:     [Cout, K]      bf16 reshaped conv weight (held resident)
    # conv_ref:  [1, Cout, TM]  f32  conv output tile (lane dense)
    # stats_ref: [1, Cout, 2]   f32  per-tile partial (sum, sum of squares)
    conv = jnp.dot(w_ref[...], p_ref[0], preferred_element_type=jnp.float32)
    conv_ref[0] = conv
    stats_ref[0, :, 0:1] = jnp.sum(conv, axis=1, keepdims=True)
    stats_ref[0, :, 1:2] = jnp.sum(conv * conv, axis=1, keepdims=True)


# ---------------------------------------------------------------------------
# Pass 2: folded BatchNorm (scale * x + shift) + ReLU, memory-bound, lane dense
# ---------------------------------------------------------------------------
def _bn_relu_kernel(conv_ref, scale_ref, shift_ref, o_ref):
    # conv_ref:  [1, Cout, TM] f32
    # scale_ref: [Cout, 1]     f32   gamma * rsqrt(var + eps)
    # shift_ref: [Cout, 1]     f32   beta - mean * scale
    o_ref[0] = jnp.maximum(conv_ref[0] * scale_ref[...] + shift_ref[...], 0.0)


# ---------------------------------------------------------------------------
# im2col in the transposed layout [N, K, OH*OW] (K ordering = cin, kh, kw), bf16.
# TODO(synk): for large shapes, fold the KH*KW taps into the kernel grid
# (shifted-window BlockSpecs on the padded activation) instead of materializing
# the KH*KW-times-duplicated patch tensor in HBM.
# ---------------------------------------------------------------------------
def _im2col_t(x_nchw, kh, kw, stride, padding, dilation, oh, ow):
    n, c, _, _ = x_nchw.shape
    x_p = jnp.pad(x_nchw, ((0, 0), (0, 0), (padding, padding), (padding, padding)))
    pieces = []
    for ih in range(kh):
        for iw in range(kw):
            pieces.append(
                x_p[:, :,
                    ih * dilation: ih * dilation + stride * (oh - 1) + 1: stride,
                    iw * dilation: iw * dilation + stride * (ow - 1) + 1: stride])
    pat = jnp.stack(pieces, axis=2)                 # [N, Cin, KH*KW, OH, OW]
    return pat.reshape(n, c * kh * kw, oh * ow)     # [N, K, OH*OW]


@functools.partial(jax.jit, static_argnames=("stride", "padding", "dilation"))
def conv_bn_relu_forward(x_nchw, weight_oihw, gamma, beta,
                         stride=1, padding=0, dilation=1):
    n, cin, h, w = x_nchw.shape
    cout, cin_w, kh, kw = weight_oihw.shape
    assert cin == cin_w
    oh = (h + 2 * padding - dilation * (kh - 1) - 1) // stride + 1
    ow = (w + 2 * padding - dilation * (kw - 1) - 1) // stride + 1
    ohw = oh * ow
    k_dim = cin * kh * kw

    # Lane-axis tile: multiple of 128, sized well under the scoped-VMEM defaults
    # (16 MiB v5e / 32 MiB v6e,v7x) even with double-buffered inputs+outputs.
    tm = min(1024, _round_up(ohw, 128))
    ohw_pad = _round_up(ohw, tm)
    num_t = ohw_pad // tm

    # bf16 matmul operands; zero-padded columns contribute exactly 0 to the
    # conv and to sum/sumsq, and the real element count is used for BN below.
    patches = _im2col_t(x_nchw.astype(jnp.bfloat16), kh, kw, stride, padding,
                        dilation, oh, ow)
    if ohw_pad != ohw:
        patches = jnp.pad(patches, ((0, 0), (0, 0), (0, ohw_pad - ohw)))
    w_mat = weight_oihw.reshape(cout, k_dim).astype(jnp.bfloat16)

    flops = 2 * n * ohw_pad * k_dim * cout
    bytes_accessed = patches.size * 2 + w_mat.size * 2 + n * cout * ohw_pad * 4

    conv_out, stats = pl.pallas_call(
        _conv_stats_kernel,
        out_shape=(
            jax.ShapeDtypeStruct((n, cout, ohw_pad), jnp.float32),
            jax.ShapeDtypeStruct((n * num_t, cout, 2), jnp.float32),
        ),
        grid=(n, num_t),
        in_specs=[
            pl.BlockSpec((1, k_dim, tm), lambda b, t: (b, 0, t)),
            pl.BlockSpec((cout, k_dim), lambda b, t: (0, 0)),
        ],
        out_specs=(
            pl.BlockSpec((1, cout, tm), lambda b, t: (b, 0, t)),
            pl.BlockSpec((1, cout, 2), lambda b, t: (b * num_t + t, 0, 0)),
        ),
        compiler_params=pltpu.CompilerParams(
            dimension_semantics=("parallel", "parallel")),
        cost_estimate=pl.CostEstimate(
            flops=flops, transcendentals=0, bytes_accessed=bytes_accessed),
    )(patches, w_mat)

    # Combine partial statistics (tiny) and fold BN into per-channel scale/shift.
    m_real = n * ohw
    sums = stats[:, :, 0].sum(axis=0)
    sumsq = stats[:, :, 1].sum(axis=0)
    mean = sums / m_real
    var = jnp.maximum(sumsq / m_real - mean * mean, 0.0)   # biased var (PyTorch BN)
    inv = lax.rsqrt(var + BN_EPS)
    g32 = gamma.astype(jnp.float32)
    b32 = beta.astype(jnp.float32)
    scale = (g32 * inv).reshape(cout, 1)
    shift = (b32 - mean * g32 * inv).reshape(cout, 1)

    out = pl.pallas_call(
        _bn_relu_kernel,
        out_shape=jax.ShapeDtypeStruct((n, cout, ohw_pad), jnp.float32),
        grid=(n, num_t),
        in_specs=[
            pl.BlockSpec((1, cout, tm), lambda b, t: (b, 0, t)),
            pl.BlockSpec((cout, 1), lambda b, t: (0, 0)),
            pl.BlockSpec((cout, 1), lambda b, t: (0, 0)),
        ],
        out_specs=pl.BlockSpec((1, cout, tm), lambda b, t: (b, 0, t)),
        compiler_params=pltpu.CompilerParams(
            dimension_semantics=("parallel", "parallel")),
    )(conv_out, scale, shift)

    # [N, Cout, OH*OW(+pad)] -> NCHW is a free reshape after dropping padding.
    return out[:, :, :ohw].reshape(n, cout, oh, ow)


if __name__ == "__main__":
    # Module: conv_bn_relu(in_channels=4, out_channels=8, kernel_size=3,
    #                      stride=1, padding=1, dilation=1, bias=False)
    N, CIN, H, W = 2, 4, 16, 16
    COUT, KSIZE, STRIDE, PAD, DIL = 8, 3, 1, 1, 1

    key = jax.random.PRNGKey(0)
    kx, kw_ = jax.random.split(key)

    x = jax.random.normal(kx, (N, CIN, H, W), dtype=jnp.float32)
    # Deterministic conv weight init (kaiming-uniform-like scale), no bias.
    fan_in = CIN * KSIZE * KSIZE
    bound = (1.0 / fan_in) ** 0.5
    weight = jax.random.uniform(
        kw_, (COUT, CIN, KSIZE, KSIZE), minval=-bound, maxval=bound,
        dtype=jnp.float32)
    # Fresh BatchNorm2d parameters: gamma=1, beta=0.
    gamma = jnp.ones((COUT,), dtype=jnp.float32)
    beta = jnp.zeros((COUT,), dtype=jnp.float32)

    out = conv_bn_relu_forward(x, weight, gamma, beta,
                               stride=STRIDE, padding=PAD, dilation=DIL)
    jax.block_until_ready(out)
    assert out.shape == (N, COUT, H, W), out.shape
    print("KERNEL_OK")
</pallas_src>

<mosaic_0001>
module attributes {stable_mosaic.version = 11 : i64} {
  func.func @_conv_stats_kernel(%arg0: i32, %arg1: i32, %arg2: memref<1x36x256xbf16, #tpu.memory_space<vmem>>, %arg3: memref<8x36xbf16, #tpu.memory_space<vmem>>, %arg4: memref<1x8x256xf32, #tpu.memory_space<vmem>>, %arg5: memref<1x8x2xf32, #tpu.memory_space<vmem>>) attributes {dimension_semantics = [#tpu.dimension_semantics<parallel>, #tpu.dimension_semantics<parallel>], iteration_bounds = array<i64: 2, 1>, scalar_prefetch = 0 : i64, scratch_operands = 0 : i64, tpu.core_type = #tpu.core_type<tc>, window_params = [{transform_indices = @transform_0, window_bounds = array<i64: 1, 36, 256>}, {pipeline_mode = #tpu.pipeline_mode<synchronous>, transform_indices = @transform_1, window_bounds = array<i64: 8, 36>}, {transform_indices = @transform_2, window_bounds = array<i64: 1, 8, 256>}, {transform_indices = @transform_3, window_bounds = array<i64: 1, 8, 2>}]} {
    %c0 = arith.constant 0 : index
    %c0_0 = arith.constant 0 : index
    %0 = vector.load %arg3[%c0, %c0_0] : memref<8x36xbf16, #tpu.memory_space<vmem>>, vector<8x36xbf16>
    %c0_1 = arith.constant 0 : index
    %c0_2 = arith.constant 0 : index
    %c0_3 = arith.constant 0 : index
    %1 = vector.load %arg2[%c0_1, %c0_2, %c0_3] : memref<1x36x256xbf16, #tpu.memory_space<vmem>>, vector<1x36x256xbf16>
    %2 = vector.shape_cast %1 : vector<1x36x256xbf16> to vector<36x256xbf16>
    %cst = arith.constant dense<0.000000e+00> : vector<8x256xf32>
    %3 = tpu.matmul %0, %2, %cst {dimension_numbers = #tpu.dot_dimension_numbers<[1], [0], [0], [1], [0, 0, 1, 1], [], []>} : vector<8x36xbf16>, vector<36x256xbf16>, vector<8x256xf32> -> vector<8x256xf32>
    %c0_4 = arith.constant 0 : index
    %c0_5 = arith.constant 0 : index
    %c0_6 = arith.constant 0 : index
    %4 = vector.load %arg4[%c0_4, %c0_5, %c0_6] : memref<1x8x256xf32, #tpu.memory_space<vmem>>, vector<1x8x256xf32>
    %5 = vector.shape_cast %4 : vector<1x8x256xf32> to vector<8x256xf32>
    %6 = vector.shape_cast %3 : vector<8x256xf32> to vector<1x8x256xf32>
    tpu.vector_store %arg4[%c0_4, %c0_5, %c0_6], %6 {strides = array<i32>} : memref<1x8x256xf32, #tpu.memory_space<vmem>>, vector<1x8x256xf32>,
    %cst_7 = arith.constant dense<0.000000e+00> : vector<8xf32>
    %7 = vector.multi_reduction <add>, %3, %cst_7 [1] : vector<8x256xf32> to vector<8xf32>
    %8 = vector.shape_cast %7 : vector<8xf32> to vector<8x1xf32>
    %c0_8 = arith.constant 0 : index
    %c0_9 = arith.constant 0 : index
    %c0_10 = arith.constant 0 : index
    %9 = vector.load %arg5[%c0_8, %c0_9, %c0_10] : memref<1x8x2xf32, #tpu.memory_space<vmem>>, vector<1x8x1xf32>
    %10 = vector.shape_cast %9 : vector<1x8x1xf32> to vector<8x1xf32>
    %11 = vector.shape_cast %8 : vector<8x1xf32> to vector<1x8x1xf32>
    tpu.vector_store %arg5[%c0_8, %c0_9, %c0_10], %11 {strides = array<i32>} : memref<1x8x2xf32, #tpu.memory_space<vmem>>, vector<1x8x1xf32>,
    %12 = arith.mulf %3, %3 : vector<8x256xf32>
    %cst_11 = arith.constant dense<0.000000e+00> : vector<8xf32>
    %13 = vector.multi_reduction <add>, %12, %cst_11 [1] : vector<8x256xf32> to vector<8xf32>
    %14 = vector.shape_cast %13 : vector<8xf32> to vector<8x1xf32>
    %c0_12 = arith.constant 0 : index
    %c0_13 = arith.constant 0 : index
    %c1 = arith.constant 1 : index
    %15 = vector.load %arg5[%c0_12, %c0_13, %c1] : memref<1x8x2xf32, #tpu.memory_space<vmem>>, vector<1x8x1xf32>
    %16 = vector.shape_cast %15 : vector<1x8x1xf32> to vector<8x1xf32>
    %17 = vector.shape_cast %14 : vector<8x1xf32> to vector<1x8x1xf32>
    tpu.vector_store %arg5[%c0_12, %c0_13, %c1], %17 {strides = array<i32>} : memref<1x8x2xf32, #tpu.memory_space<vmem>>, vector<1x8x1xf32>,
    return
  }
  func.func @transform_0(%arg0: i32, %arg1: i32) -> (i32, i32, i32) {
    %c0_i32 = arith.constant 0 : i32
    %c0_i32_0 = arith.constant 0 : i32
    return %arg0, %c0_i32, %arg1 : i32, i32, i32
  }
  func.func @transform_1(%arg0: i32, %arg1: i32) -> (i32, i32) {
    %c0_i32 = arith.constant 0 : i32
    %c0_i32_0 = arith.constant 0 : i32
    %c0_i32_1 = arith.constant 0 : i32
    return %c0_i32, %c0_i32_0 : i32, i32
  }
  func.func @transform_2(%arg0: i32, %arg1: i32) -> (i32, i32, i32) {
    %c0_i32 = arith.constant 0 : i32
    %c0_i32_0 = arith.constant 0 : i32
    return %arg0, %c0_i32, %arg1 : i32, i32, i32
  }
  func.func @transform_3(%arg0: i32, %arg1: i32) -> (i32, i32, i32) {
    %c1_i32 = arith.constant 1 : i32
    %0 = arith.muli %arg0, %c1_i32 : i32
    %1 = arith.addi %0, %arg1 : i32
    %c0_i32 = arith.constant 0 : i32
    %c0_i32_0 = arith.constant 0 : i32
    %c0_i32_1 = arith.constant 0 : i32
    return %1, %c0_i32, %c0_i32_0 : i32, i32, i32
  }
}

module attributes {stable_mosaic.version = 11 : i64} {
  func.func @_bn_relu_kernel(%arg0: i32, %arg1: i32, %arg2: memref<1x8x256xf32, #tpu.memory_space<vmem>>, %arg3: memref<8x1xf32, #tpu.memory_space<vmem>>, %arg4: memref<8x1xf32, #tpu.memory_space<vmem>>, %arg5: memref<1x8x256xf32, #tpu.memory_space<vmem>>) attributes {dimension_semantics = [#tpu.dimension_semantics<parallel>, #tpu.dimension_semantics<parallel>], iteration_bounds = array<i64: 2, 1>, scalar_prefetch = 0 : i64, scratch_operands = 0 : i64, tpu.core_type = #tpu.core_type<tc>, window_params = [{transform_indices = @transform_0, window_bounds = array<i64: 1, 8, 256>}, {pipeline_mode = #tpu.pipeline_mode<synchronous>, transform_indices = @transform_1, window_bounds = array<i64: 8, 1>}, {pipeline_mode = #tpu.pipeline_mode<synchronous>, transform_indices = @transform_2, window_bounds = array<i64: 8, 1>}, {transform_indices = @transform_3, window_bounds = array<i64: 1, 8, 256>}]} {
    %c0 = arith.constant 0 : index
    %c0_0 = arith.constant 0 : index
    %c0_1 = arith.constant 0 : index
    %0 = vector.load %arg2[%c0, %c0_0, %c0_1] : memref<1x8x256xf32, #tpu.memory_space<vmem>>, vector<1x8x256xf32>
    %1 = vector.shape_cast %0 : vector<1x8x256xf32> to vector<8x256xf32>
    %c0_2 = arith.constant 0 : index
    %c0_3 = arith.constant 0 : index
    %2 = vector.load %arg3[%c0_2, %c0_3] : memref<8x1xf32, #tpu.memory_space<vmem>>, vector<8x1xf32>
    %3 = vector.broadcast %2 : vector<8x1xf32> to vector<8x256xf32>
    %4 = arith.mulf %1, %3 : vector<8x256xf32>
    %c0_4 = arith.constant 0 : index
    %c0_5 = arith.constant 0 : index
    %5 = vector.load %arg4[%c0_4, %c0_5] : memref<8x1xf32, #tpu.memory_space<vmem>>, vector<8x1xf32>
    %6 = vector.broadcast %5 : vector<8x1xf32> to vector<8x256xf32>
    %7 = arith.addf %4, %6 : vector<8x256xf32>
    %cst = arith.constant 0.000000e+00 : f32
    %8 = vector.broadcast %cst : f32 to vector<8x256xf32>
    %9 = arith.maximumf %7, %8 : vector<8x256xf32>
    %c0_6 = arith.constant 0 : index
    %c0_7 = arith.constant 0 : index
    %c0_8 = arith.constant 0 : index
    %10 = vector.load %arg5[%c0_6, %c0_7, %c0_8] : memref<1x8x256xf32, #tpu.memory_space<vmem>>, vector<1x8x256xf32>
    %11 = vector.shape_cast %10 : vector<1x8x256xf32> to vector<8x256xf32>
    %12 = vector.shape_cast %9 : vector<8x256xf32> to vector<1x8x256xf32>
    tpu.vector_store %arg5[%c0_6, %c0_7, %c0_8], %12 {strides = array<i32>} : memref<1x8x256xf32, #tpu.memory_space<vmem>>, vector<1x8x256xf32>,
    return
  }
  func.func @transform_0(%arg0: i32, %arg1: i32) -> (i32, i32, i32) {
    %c0_i32 = arith.constant 0 : i32
    %c0_i32_0 = arith.constant 0 : i32
    return %arg0, %c0_i32, %arg1 : i32, i32, i32
  }
  func.func @transform_1(%arg0: i32, %arg1: i32) -> (i32, i32) {
    %c0_i32 = arith.constant 0 : i32
    %c0_i32_0 = arith.constant 0 : i32
    %c0_i32_1 = arith.constant 0 : i32
    return %c0_i32, %c0_i32_0 : i32, i32
  }
  func.func @transform_2(%arg0: i32, %arg1: i32) -> (i32, i32) {
    %c0_i32 = arith.constant 0 : i32
    %c0_i32_0 = arith.constant 0 : i32
    %c0_i32_1 = arith.constant 0 : i32
    return %c0_i32, %c0_i32_0 : i32, i32
  }
  func.func @transform_3(%arg0: i32, %arg1: i32) -> (i32, i32, i32) {
    %c0_i32 = arith.constant 0 : i32
    %c0_i32_0 = arith.constant 0 : i32
    return %arg0, %c0_i32, %arg1 : i32, i32, i32
  }
}

</mosaic_0001>

<bundles_post_ra>
// kernel: conv_bn_relu_forward.2
= control target key start
LH: loop header
LB: loop body
LE: loop exit
PB: predicated region body
PF: predicated region fallthrough
CT: control target
= control target key end

     0   :  { %s533_s12 = smov 0   ;;  %s535_s13 = smov 0   ;;  %s577_s0 = inlined_call_operand.vmem [shape: bf16[2,36,256], index: 0, kind: input, shape index: {}]   ;;  %s578_s1 = inlined_call_operand.vmem [shape: bf16[8,36], index: 1, kind: input, shape index: {}]   ;;  %s579_s2 = inlined_call_operand.vmem [shape: f32[2,8,256], index: 2, kind: output, shape index: {0}]   ;;  %s580_s3 = inlined_call_operand.vmem [shape: f32[2,8,2], index: 3, kind: output, shape index: {1}]  }
   0x1   :  { %s537_s14 = smov 0  }
   0x2 LB: > { %s26_s15 = sadd.s32 1, %s507_s13  ;;  %p434_p0 = scmp.ge.s32.totalorder %s511_s14, 1  ;;  %s511_s14 = sphi %s537_s14, %s14_s14   ;;  %s507_s13 = sphi %s535_s13, %s582_s13   ;;  %s503_s12 = sphi %s533_s12, %s581_s12  }
   0x3   : > { %p28_p1 = scmp.ge.s32.totalorder %s26_s15, 2  ;;  %p163_p2 = scmp.lt.s32.totalorder %s511_s14, 3 }
   0x5   : > { %s584_s15 = smov (%p28_p1, %s26_s15), 0  ;;  %p164_p3 = pnand %p434_p0, %p163_p2 }
   0x6   : > { %p201_p4 = scmp.lt.s32.totalorder (!%p164_p3), %s503_s12, 1 }
   0x7   : > { %167 = sbr.rel (%p164_p3) target bundleno = 286 (0x11e), region = 28 }
   0xc   : > { %s586_s12 = smov (!%p201_p4, %s503_s12), 1  ;;  %vm262_vm0 = vcmask 1041408   ;;  %v227_v19 = vld [vmem:[%s578_s1] sm:$0xf]  ;;  %vm258_vm1 = vcmask 293888   ;;  %vm300_vm2 = vcmask 7168  }
   0xd   : > { %s464_s16 = smul.u32 40, %s586_s12  ;;  %s459_s22 = sshll.u32 %s586_s12, 4  ;;  %vm307_vm3 = vcmask 15368  }
   0xe   : > { %s218_s25 = scalar_lea.vmem %s579_s2, %s459_s22  ;;  %s438_s26 = sshll.u32 %s586_s12, 3 }
   0xf   : > { %s208_s19 = scalar_lea.vmem %s577_s0, %s464_s16  ;;  %s224_s29 = scalar_lea.vmem %s580_s3, %s438_s26 }
  0x10   : > { %v232_v0 = vld [vmem:[%s208_s19 + $0x20] sm:$0x33]  ;;  %v449_v3 = vld [vmem:[%s208_s19 + $0x10] sm:$0xf]  ;;  %v463_v6 = vld [vmem:[%s208_s19 + $0x14] sm:$0xf0] }
  0x11   : > { %v246_v1 = vunpack.c.l.b16 %v232_v0  ;;  %v247_v2 = vunpack.c.h.b16 %v232_v0  ;;  %v462_v7 = vld [vmem:[%s208_s19 + $0x14] sm:$0xf]  ;;  %v451_v8 = vld [vmem:[%s208_s19 + $0x18] sm:$0xf0]  ;;  %v450_v11 = vor.u32 %v463_v6, %v449_v3  ;;  %v441_v13 = vld [vmem:[%s208_s19] sm:$0xf] }
  0x12   : > { %v454_v12 = vor.u32 %v462_v7, %v451_v8  ;;  %v461_v14 = vld [vmem:[%s208_s19 + $0x4] sm:$0xf0]  ;;  %v460_v15 = vld [vmem:[%s208_s19 + $0x4] sm:$0xf]  ;;  %v443_v16 = vld [vmem:[%s208_s19 + $0x8] sm:$0xf0] }
  0x13   : > { %v252_v4 = vpack.c.b16 %v246_v1, %v246_v1  ;;  %v253_v5 = vpack.c.b16 %v247_v2, %v247_v2  ;;  %v442_v17 = vor.u32 %v461_v14, %v441_v13  ;;  %v446_v18 = vor.u32 %v460_v15, %v443_v16 }
  0x15   : > { %v264_v9 = vsel %vm262_vm0, %v252_v4, 0  ;;  %v267_v10 = vsel %vm262_vm0, %v253_v5, 0 }
  0x16   : > { %274 = vmatpush.bf16.msra.mxu0 %v264_v9  ;;  %287 = vmatpush.bf16.msra.mxu1 %v267_v10 }
  0x1a   : > { %275 = vmatpush.bf16.msra.mxu0 %v450_v11  ;;  %288 = vmatpush.bf16.msra.mxu1 %v454_v12 }
  0x1e   : > { %276 = vmatpush.bf16.msra.mxu0 %v442_v17  ;;  %289 = vmatpush.bf16.msra.mxu1 %v446_v18 }
  0x21   : > { %455 = vmatmul.msk.bf16.vlgmr.msra.gmra.mxu0 %vm258_vm1, %v227_v19  ;;  %456 = vmatmul.msk.bf16.vlgmr.msra.gmra.mxu1 %vm258_vm1, %v227_v19 }
  0x9e   : > { %v278_v20 = vpop.f32.mrf.mxu0  ;;  %v291_v21 = vpop.f32.mrf.mxu1 }
  0x9f   : > { %295 = vst [vmem:[%s218_s25] sm:$0xff] %v278_v20  ;;  %v297_v22 = vadd.f32 %v291_v21, %v278_v20  ;;  %v302_v23 = vmul.f32 %v278_v20, %v278_v20  ;;  %v303_v24 = vmul.f32 %v291_v21, %v291_v21 }
  0xa0   : > { %296 = vst [vmem:[%s218_s25 + $0x8] sm:$0xff] %v291_v21 }
  0xa1   : > { %298 = vadd.xlane.f32.xlu0 %v297_v22  ;;  %v304_v27 = vadd.f32 %v303_v24, %v302_v23 }
  0xa6   : > { %v280_v25 = vpop.f32.mrf.mxu0  ;;  %v293_v26 = vpop.f32.mrf.mxu1 }
  0xa9   : > { %305 = vadd.xlane.f32.xlu0 %v304_v27 }
 0x114   : > { %v299_v28 = vpop.xlane.xlu0 %298 }
 0x115   : > { %301 = vst.msk [vmem:[%s224_s29] sm:$0xff] %vm300_vm2, %v299_v28 }
 0x11c   : > { %v306_v29 = vpop.xlane.xlu0 %305 }
 0x11d   : > { %308 = vst.msk [vmem:[%s224_s29] sm:$0xff] %vm307_vm3, %v306_v29 }
 0x11e PF: > { %s14_s14 = sadd.s32 1, %s511_s14   ;;  %s581_s12 = smov %s507_s13 }
 0x11f   : > { %p11_p5 = scmp.ge.s32.totalorder %s14_s14, 4   ;;  %s582_s13 = smov %s584_s15 }
 0x121   :  { %13 = sbr.rel (!%p11_p5) target bundleno = 2 (0x2), region = 70 }

// kernel: conv_bn_relu_forward.3
= control target key start
LH: loop header
LB: loop body
LE: loop exit
PB: predicated region body
PF: predicated region fallthrough
CT: control target
= control target key end

     0   :  { %s403_s12 = smov 0   ;;  %s405_s13 = smov 0   ;;  %s442_s0 = inlined_call_operand.vmem [shape: f32[2,8,256], index: 0, kind: input, shape index: {}]   ;;  %s443_s1 = inlined_call_operand.vmem [shape: f32[8,1], index: 1, kind: input, shape index: {}]   ;;  %s444_s2 = inlined_call_operand.vmem [shape: f32[8,1], index: 2, kind: input, shape index: {}]   ;;  %s445_s3 = inlined_call_operand.vmem [shape: f32[2,8,256], index: 3, kind: output, shape index: {}]  }
   0x1   :  { %s407_s14 = smov 0  }
   0x2 LB: > { %s25_s15 = sadd.s32 1, %s376_s13  ;;  %p323_p0 = scmp.ge.s32.totalorder %s380_s14, 1  ;;  %s380_s14 = sphi %s407_s14, %s13_s14   ;;  %s376_s13 = sphi %s405_s13, %s447_s13   ;;  %s372_s12 = sphi %s403_s12, %s446_s12  }
   0x3   : > { %p27_p1 = scmp.ge.s32.totalorder %s25_s15, 2  ;;  %p158_p2 = scmp.lt.s32.totalorder %s380_s14, 3 }
   0x5   : > { %s449_s15 = smov (%p27_p1, %s25_s15), 0  ;;  %p159_p3 = pnand %p323_p0, %p158_p2 }
   0x6   : > { %p191_p4 = scmp.lt.s32.totalorder (!%p159_p3), %s372_s12, 1 }
   0x7   : > { %162 = sbr.rel (%p159_p3) target bundleno = 143 (0x8f), region = 32 }
   0xc   : > { %v212_v0 = vld [vmem:[%s443_s1] sm:$0xff]  ;;  %v382_v1 = vmov 0   ;;  %s451_s12 = smov (!%p191_p4, %s372_s12), 1 }
   0xd   : > { %357 = vset.pattern.permute.xlu0 %v382_v1  ;;  %v220_v2 = vld [vmem:[%s444_s2] sm:$0xff]  ;;  %s330_s20 = sshll.u32 %s451_s12, 4 }
   0xe   : > { %215 = vperm.xlu0 %357, %v212_v0   ;;  %s198_s23 = scalar_lea.vmem %s442_s0, %s330_s20  ;;  %s208_s26 = scalar_lea.vmem %s445_s3, %s330_s20 }
   0xf   : > { %v210_v4 = vld [vmem:[%s198_s23] sm:$0xff]  ;;  %v211_v5 = vld [vmem:[%s198_s23 + $0x8] sm:$0xff] }
  0x16   : > { %223 = vperm.xlu0 %357, %v220_v2  }
  0x80   : > { %v216_v3 = vpop.permute.xlu0 %215 }
  0x81   : > { %v218_v6 = vmul.f32 %v216_v3, %v210_v4  ;;  %v219_v7 = vmul.f32 %v216_v3, %v211_v5 }
  0x88   : > { %v224_v8 = vpop.permute.xlu0 %223 }
  0x89   : > { %v226_v9 = vadd.f32 %v224_v8, %v218_v6  ;;  %v227_v10 = vadd.f32 %v224_v8, %v219_v7 }
  0x8b   : > { %v228_v11 = vmax.f32 %v226_v9, 0.0  ;;  %v229_v12 = vmax.f32 %v227_v10, 0.0 }
  0x8d   : > { %230 = vst [vmem:[%s208_s26] sm:$0xff] %v228_v11 }
  0x8e   : > { %231 = vst [vmem:[%s208_s26 + $0x8] sm:$0xff] %v229_v12 }
  0x8f PF: > { %s13_s14 = sadd.s32 1, %s380_s14   ;;  %s446_s12 = smov %s376_s13 }
  0x90   : > { %p10_p5 = scmp.ge.s32.totalorder %s13_s14, 4   ;;  %s447_s13 = smov %s449_s15 }
  0x92   :  { %12 = sbr.rel (!%p10_p5) target bundleno = 2 (0x2), region = 62 }

</bundles_post_ra>
